<compile_context>
chip_gen: v6e
topology: v6e:2x2x1
jax: 0.10.0
libtpu: 0.0.40
codegen_flags: <defaults>
</compile_context>

<pallas_src>
import functools

import jax
import jax.numpy as jnp
import numpy as np
from jax import lax
from jax.experimental import pallas as pl
from jax.experimental.pallas import tpu as pltpu

_PI = 3.141592653589793
_HALF_PI = 1.5707963267948966
_QUARTER_PI = 0.7853981633974483
_TAN_PI_8 = 0.4142135623730951

_LANES = 128
_CHUNK = 8            # sublane rows per inner-loop step (one vreg per temp)
_PALLAS_MIN_JOINTS = 2048   # TODO(synk): re-measure crossover per generation


# ----------------------------- in-kernel math -------------------------------
def _rsqrt1(x):
    """rsqrt + one Newton step: full accuracy even if HW rsqrt is approximate."""
    r = lax.rsqrt(x)
    return r * (1.5 - 0.5 * x * r * r)


def _atan_01(a):
    """atan(a) for a in [0, 1] (cephes f32 polynomial + pi/4 reduction)."""
    use_shift = a > _TAN_PI_8
    x = jnp.where(use_shift, (a - 1.0) / (a + 1.0), a)     # exact divide
    z = x * x
    p = ((((8.05374449538e-2 * z - 1.38776856032e-1) * z
           + 1.99777106478e-1) * z - 3.33329491539e-1) * z) * x + x
    return jnp.where(use_shift, p + _QUARTER_PI, p)


def _atan2_nonneg(y, x):
    """atan2(y, x) restricted to y >= 0, x >= 0 (no quadrant logic needed)."""
    mx = jnp.maximum(x, y)
    mn = jnp.minimum(x, y)
    a = mn / jnp.maximum(mx, 1e-30)                         # exact divide
    r = _atan_01(a)
    return jnp.where(y > x, _HALF_PI - r, r)


def _rotmat_to_aa_kernel(r_ref, o_ref):
    """SPIN/kornia rotation_matrix_to_angle_axis.

    r_ref: (9, Rb, 128)  component-major: plane c holds R[c//3][c%3]; joints
                         are packed (sublane-row, lane).
    o_ref: (3, Rb, 128)  angle-axis (x, y, z), same joint packing.
    """
    rb = r_ref.shape[1]

    def chunk(ci, carry):
        off = pl.multiple_of(ci * _CHUNK, _CHUNK)
        sl = pl.ds(off, _CHUNK)
        r = r_ref[:, sl, :]                                 # (9, 8, 128)
        r00, r01, r02 = r[0], r[1], r[2]
        r10, r11, r12 = r[3], r[4], r[5]
        r20, r21, r22 = r[6], r[7], r[8]

        # rotation matrix -> quaternion (the torch reference transposes first;
        # the formulas below are written directly in terms of R; the 4th
        # homogeneous column is never read).
        t0 = 1.0 + r00 - r11 - r22
        t1 = 1.0 - r00 + r11 - r22
        t2 = 1.0 - r00 - r11 + r22
        t3 = 1.0 + r00 + r11 + r22

        mask_d2 = r22 < 1e-6
        mask_d0_d1 = r00 > r11
        mask_d0_nd1 = r00 < -r11
        c0 = jnp.logical_and(mask_d2, mask_d0_d1)
        c1 = jnp.logical_and(mask_d2, jnp.logical_not(mask_d0_d1))
        c2 = jnp.logical_and(jnp.logical_not(mask_d2), mask_d0_nd1)

        def sel(a0, a1, a2, a3):
            return jnp.where(c0, a0, jnp.where(c1, a1, jnp.where(c2, a2, a3)))

        qw = sel(r21 - r12, r02 - r20, r10 - r01, t3)
        qx = sel(t0, r10 + r01, r02 + r20, r21 - r12)
        qy = sel(r10 + r01, t1, r21 + r12, r02 - r20)
        qz = sel(r02 + r20, r21 + r12, t2, r10 - r01)
        t = sel(t0, t1, t2, t3)

        scale = 0.5 * _rsqrt1(t)                            # EUP rsqrt + Newton
        qw = qw * scale; qx = qx * scale; qy = qy * scale; qz = qz * scale

        # quaternion -> angle-axis; single atan2 evaluation:
        #   atan2(-s,-w) = -atan2(s,|w|) and atan2(s,w) = atan2(s,|w|), s,w>=0
        sin2 = qx * qx + qy * qy + qz * qz
        inv_sin = _rsqrt1(jnp.maximum(sin2, 1e-30))         # shared EUP rsqrt
        sin_t = sin2 * inv_sin                              # == sqrt(sin2)
        theta = _atan2_nonneg(sin_t, jnp.abs(qw))
        two_theta = 2.0 * jnp.where(qw < 0.0, -theta, theta)
        k = jnp.where(sin2 > 0.0, two_theta * inv_sin, 2.0)

        aax = qx * k
        aay = qy * k
        aaz = qz * k
        # pred_pose_euler[isnan] = 0.0
        aax = jnp.where(jnp.isnan(aax), 0.0, aax)
        aay = jnp.where(jnp.isnan(aay), 0.0, aay)
        aaz = jnp.where(jnp.isnan(aaz), 0.0, aaz)

        # unmasked full-lane stores
        o_ref[0, sl, :] = aax
        o_ref[1, sl, :] = aay
        o_ref[2, sl, :] = aaz
        return carry

    lax.fori_loop(0, rb // _CHUNK, chunk, 0)


# ------------------------------ Pallas wrapper -------------------------------
def _round_up(x, m):
    return ((x + m - 1) // m) * m


def rotation_matrix_to_angle_axis_pallas(rotmats, block_rows=512):
    """rotmats: (N, 3, 3) f32 -> angle-axis (N, 3) f32 via a Pallas TPU kernel."""
    n = rotmats.shape[0]
    rows = pl.cdiv(n, _LANES)                       # 128-lane rows of joints

    # ~8 pipelined grid steps for large inputs; block sublane count multiple
    # of 8; capped at 512 rows (in+out double buffers ~6 MiB). `block_rows`
    # is forced to a multiple of 8 so caller overrides stay legal.
    rb = min(max(_round_up(pl.cdiv(rows, 8), 8), 64), 512)
    rb = min(rb, _round_up(rows, 8), _round_up(block_rows, 8))
    nblk = _round_up(pl.cdiv(rows, rb), 2)          # even grid -> 2-TC split
    rows_pad = nblk * rb
    n_pad = rows_pad * _LANES

    # Single component-major relayout pass (transpose + pad fuse in XLA).
    #   axis 0   = the 9 row-major rotation-matrix entries R[i][j] at 3*i+j
    #   axes 1,2 = joints packed (sublane-row, lane); padded columns are zeros
    # TODO(synk): a producer emitting this (9, rows, 128) slab directly would
    # remove the remaining extra HBM pass entirely.
    rot9 = rotmats.reshape(n, 9).astype(jnp.float32)
    slab = jnp.pad(rot9.T, ((0, 0), (0, n_pad - n))).reshape(
        9, rows_pad, _LANES)

    out = pl.pallas_call(
        _rotmat_to_aa_kernel,
        out_shape=jax.ShapeDtypeStruct((3, rows_pad, _LANES), jnp.float32),
        grid=(nblk,),
        in_specs=[pl.BlockSpec((9, rb, _LANES), lambda i: (0, i, 0))],
        out_specs=pl.BlockSpec((3, rb, _LANES), lambda i: (0, i, 0)),
        compiler_params=pltpu.CompilerParams(
            dimension_semantics=("parallel",)),     # megacore split (v7x)
    )(slab)
    return out.reshape(3, n_pad)[:, :n].T           # (N, 3)


# ------------------------- pure-JAX path (fallback/check) --------------------
def _rotmat_to_aa_jax(R):
    """Pure-JAX mirror of the SPIN rotation_matrix_to_angle_axis."""
    r00 = R[:, 0, 0]; r01 = R[:, 0, 1]; r02 = R[:, 0, 2]
    r10 = R[:, 1, 0]; r11 = R[:, 1, 1]; r12 = R[:, 1, 2]
    r20 = R[:, 2, 0]; r21 = R[:, 2, 1]; r22 = R[:, 2, 2]
    t0 = 1 + r00 - r11 - r22
    q0 = jnp.stack([r21 - r12, t0, r10 + r01, r02 + r20], -1)
    t1 = 1 - r00 + r11 - r22
    q1 = jnp.stack([r02 - r20, r10 + r01, t1, r21 + r12], -1)
    t2 = 1 - r00 - r11 + r22
    q2 = jnp.stack([r10 - r01, r02 + r20, r21 + r12, t2], -1)
    t3 = 1 + r00 + r11 + r22
    q3 = jnp.stack([t3, r21 - r12, r02 - r20, r10 - r01], -1)
    md2 = r22 < 1e-6
    md01 = r00 > r11
    md0n1 = r00 < -r11
    c0 = md2 & md01
    c1 = md2 & ~md01
    c2 = ~md2 & md0n1
    q = jnp.where(c0[:, None], q0,
                  jnp.where(c1[:, None], q1, jnp.where(c2[:, None], q2, q3)))
    t = jnp.where(c0, t0, jnp.where(c1, t1, jnp.where(c2, t2, t3)))
    q = q * (0.5 / jnp.sqrt(t))[:, None]
    qw, qx, qy, qz = q[:, 0], q[:, 1], q[:, 2], q[:, 3]
    sin2 = qx * qx + qy * qy + qz * qz
    sin_t = jnp.sqrt(sin2)
    two_theta = 2.0 * jnp.where(qw < 0.0,
                                jnp.arctan2(-sin_t, -qw),
                                jnp.arctan2(sin_t, qw))
    k = jnp.where(sin2 > 0.0, two_theta / sin_t, 2.0)
    aa = jnp.stack([qx * k, qy * k, qz * k], -1)
    return jnp.where(jnp.isnan(aa), 0.0, aa)


# ------------------------------- module forward -------------------------------
@functools.partial(jax.jit, static_argnames=("init_frame", "force_pallas"))
def smplify3d_forward(pred_pose, pred_betas, pred_global_orient,
                      gt_joints=None, init_frame=True, force_pallas=False):
    """Mirrors SMPLify3D.forward.

    pred_pose:          (B, 23, 3, 3) f32 rotation matrices
    pred_global_orient: (B,  1, 3, 3) f32 rotation matrix
    pred_betas:         (B, 10)       f32
    Returns (opt_pose (B,69), opt_betas (B,10), opt_global_orient (B,3)).
    """
    del gt_joints, init_frame
    batch_size = pred_pose.shape[0]
    integrated_pose = jnp.concatenate([pred_global_orient, pred_pose], axis=1)
    rotmats = integrated_pose.reshape(-1, 3, 3)          # (B*24, 3, 3)
    if force_pallas or rotmats.shape[0] >= _PALLAS_MIN_JOINTS:
        aa = rotation_matrix_to_angle_axis_pallas(rotmats)
    else:
        # tiny problem: fixed pallas_call + relayout overhead dominates; let
        # XLA fuse the elementwise conversion instead.
        aa = _rotmat_to_aa_jax(rotmats)
    pred_pose_euler = aa.reshape(batch_size, -1)         # (B, 72)
    opt_init_pose = pred_pose_euler[:, 3:]
    opt_init_global_orient = pred_pose_euler[:, :3]
    opt_init_betas = pred_betas
    # TODO(synk): run_smplify's iterative Adam fitting (external SMPL
    # body_model, autograd backward, GMM/L2/angle priors, ftol/gtol loop) has
    # no clean Pallas equivalent; result equals 0 optimizer steps.
    return opt_init_pose, opt_init_betas, opt_init_global_orient


# ------------------------------ test utilities -------------------------------
def _rodrigues(aa):
    """(N,3) axis-angle -> (N,3,3) rotation matrices (setup glue, plain JAX)."""
    theta = jnp.linalg.norm(aa, axis=-1, keepdims=True)
    theta = jnp.maximum(theta, 1e-8)
    k = aa / theta
    kx, ky, kz = k[:, 0], k[:, 1], k[:, 2]
    zeros = jnp.zeros_like(kx)
    kmat = jnp.stack([zeros, -kz, ky, kz, zeros, -kx, -ky, kx, zeros],
                     axis=-1).reshape(-1, 3, 3)
    theta = theta[:, :, None]
    eye = jnp.eye(3, dtype=aa.dtype)[None]
    return eye + jnp.sin(theta) * kmat + (1.0 - jnp.cos(theta)) * (kmat @ kmat)


if __name__ == "__main__":
    key = jax.random.PRNGKey(0)
    k1, k2, k3 = jax.random.split(key, 3)
    B = 2

    aa_init = 0.5 * jax.random.normal(k1, (B, 24, 3), dtype=jnp.float32)
    rotmats = _rodrigues(aa_init.reshape(-1, 3)).reshape(B, 24, 3, 3)
    pred_global_orient = rotmats[:, :1]          # (B, 1, 3, 3)
    pred_pose = rotmats[:, 1:]                   # (B, 23, 3, 3)
    pred_betas = 0.1 * jax.random.normal(k2, (B, 10), dtype=jnp.float32)

    # 1) forward with the Pallas kernel forced on (exercises the kernel at B=2)
    opt_pose, opt_betas, opt_go = smplify3d_forward(
        pred_pose, pred_betas, pred_global_orient, force_pallas=True)
    jax.block_until_ready((opt_pose, opt_betas, opt_go))
    assert opt_pose.shape == (B, 69)
    assert opt_betas.shape == (B, 10)
    assert opt_go.shape == (B, 3)

    ref_aa = _rotmat_to_aa_jax(rotmats.reshape(-1, 3, 3)).reshape(B, -1)
    got = jnp.concatenate([opt_go, opt_pose], axis=1)
    # exact divides + Newton-refined rsqrt: expected error ~1e-5; atol kept
    # generous for cross-generation EUP differences.
    np.testing.assert_allclose(np.asarray(got), np.asarray(ref_aa),
                               rtol=0.0, atol=2e-3)
    np.testing.assert_allclose(np.asarray(opt_betas), np.asarray(pred_betas))

    # 2) default small-batch path (pure-JAX fallback) matches the reference
    opt_pose2, _, opt_go2 = smplify3d_forward(pred_pose, pred_betas,
                                              pred_global_orient)
    jax.block_until_ready(opt_pose2)
    np.testing.assert_allclose(
        np.asarray(jnp.concatenate([opt_go2, opt_pose2], axis=1)),
        np.asarray(ref_aa), rtol=0.0, atol=1e-5)

    # 3) multi-block pipelined path (grid > 1) with a small forced block size
    n_big = 3 * 8 * 128                                   # rows=24, rb=8 -> grid=4
    aa_big = 0.5 * jax.random.normal(k3, (n_big, 3), dtype=jnp.float32)
    rot_big = _rodrigues(aa_big)
    aa_pallas = rotation_matrix_to_angle_axis_pallas(rot_big, block_rows=8)
    jax.block_until_ready(aa_pallas)
    np.testing.assert_allclose(np.asarray(aa_pallas),
                               np.asarray(_rotmat_to_aa_jax(rot_big)),
                               rtol=0.0, atol=2e-3)

    print("KERNEL_OK")
</pallas_src>

<mosaic_0001>
module attributes {stable_mosaic.version = 11 : i64} {
  func.func @_rotmat_to_aa_kernel(%arg0: i32, %arg1: memref<9x8x128xf32, #tpu.memory_space<vmem>>, %arg2: memref<3x8x128xf32, #tpu.memory_space<vmem>>) attributes {dimension_semantics = [#tpu.dimension_semantics<parallel>], iteration_bounds = array<i64: 2>, scalar_prefetch = 0 : i64, scratch_operands = 0 : i64, tpu.core_type = #tpu.core_type<tc>, window_params = [{transform_indices = @transform_0, window_bounds = array<i64: 9, 8, 128>}, {transform_indices = @transform_1, window_bounds = array<i64: 3, 8, 128>}]} {
    %c0_i32 = arith.constant 0 : i32
    %c8_i32 = arith.constant 8 : i32
    %0 = arith.muli %c0_i32, %c8_i32 : i32
    %1 = tpu.assume_multiple %0, 8 : i32
    %c0 = arith.constant 0 : index
    %2 = arith.index_cast %1 : i32 to index
    %c0_0 = arith.constant 0 : index
    %3 = vector.load %arg1[%c0, %2, %c0_0] : memref<9x8x128xf32, #tpu.memory_space<vmem>>, vector<9x8x128xf32>
    %4 = vector.extract_strided_slice %3 {offsets = [0, 0, 0], sizes = [1, 8, 128], strides = [1, 1, 1]} : vector<9x8x128xf32> to vector<1x8x128xf32>
    %5 = vector.shape_cast %4 : vector<1x8x128xf32> to vector<8x128xf32>
    %6 = vector.extract_strided_slice %3 {offsets = [1, 0, 0], sizes = [1, 8, 128], strides = [1, 1, 1]} : vector<9x8x128xf32> to vector<1x8x128xf32>
    %7 = vector.shape_cast %6 : vector<1x8x128xf32> to vector<8x128xf32>
    %8 = vector.extract_strided_slice %3 {offsets = [2, 0, 0], sizes = [1, 8, 128], strides = [1, 1, 1]} : vector<9x8x128xf32> to vector<1x8x128xf32>
    %9 = vector.shape_cast %8 : vector<1x8x128xf32> to vector<8x128xf32>
    %10 = vector.extract_strided_slice %3 {offsets = [3, 0, 0], sizes = [1, 8, 128], strides = [1, 1, 1]} : vector<9x8x128xf32> to vector<1x8x128xf32>
    %11 = vector.shape_cast %10 : vector<1x8x128xf32> to vector<8x128xf32>
    %12 = vector.extract_strided_slice %3 {offsets = [4, 0, 0], sizes = [1, 8, 128], strides = [1, 1, 1]} : vector<9x8x128xf32> to vector<1x8x128xf32>
    %13 = vector.shape_cast %12 : vector<1x8x128xf32> to vector<8x128xf32>
    %14 = vector.extract_strided_slice %3 {offsets = [5, 0, 0], sizes = [1, 8, 128], strides = [1, 1, 1]} : vector<9x8x128xf32> to vector<1x8x128xf32>
    %15 = vector.shape_cast %14 : vector<1x8x128xf32> to vector<8x128xf32>
    %16 = vector.extract_strided_slice %3 {offsets = [6, 0, 0], sizes = [1, 8, 128], strides = [1, 1, 1]} : vector<9x8x128xf32> to vector<1x8x128xf32>
    %17 = vector.shape_cast %16 : vector<1x8x128xf32> to vector<8x128xf32>
    %18 = vector.extract_strided_slice %3 {offsets = [7, 0, 0], sizes = [1, 8, 128], strides = [1, 1, 1]} : vector<9x8x128xf32> to vector<1x8x128xf32>
    %19 = vector.shape_cast %18 : vector<1x8x128xf32> to vector<8x128xf32>
    %20 = vector.extract_strided_slice %3 {offsets = [8, 0, 0], sizes = [1, 8, 128], strides = [1, 1, 1]} : vector<9x8x128xf32> to vector<1x8x128xf32>
    %21 = vector.shape_cast %20 : vector<1x8x128xf32> to vector<8x128xf32>
    %cst = arith.constant 1.000000e+00 : f32
    %22 = vector.broadcast %cst : f32 to vector<8x128xf32>
    %23 = arith.addf %22, %5 : vector<8x128xf32>
    %24 = arith.subf %23, %13 : vector<8x128xf32>
    %25 = arith.subf %24, %21 : vector<8x128xf32>
    %cst_1 = arith.constant 1.000000e+00 : f32
    %26 = vector.broadcast %cst_1 : f32 to vector<8x128xf32>
    %27 = arith.subf %26, %5 : vector<8x128xf32>
    %28 = arith.addf %27, %13 : vector<8x128xf32>
    %29 = arith.subf %28, %21 : vector<8x128xf32>
    %cst_2 = arith.constant 1.000000e+00 : f32
    %30 = vector.broadcast %cst_2 : f32 to vector<8x128xf32>
    %31 = arith.subf %30, %5 : vector<8x128xf32>
    %32 = arith.subf %31, %13 : vector<8x128xf32>
    %33 = arith.addf %32, %21 : vector<8x128xf32>
    %cst_3 = arith.constant 1.000000e+00 : f32
    %34 = vector.broadcast %cst_3 : f32 to vector<8x128xf32>
    %35 = arith.addf %34, %5 : vector<8x128xf32>
    %36 = arith.addf %35, %13 : vector<8x128xf32>
    %37 = arith.addf %36, %21 : vector<8x128xf32>
    %cst_4 = arith.constant 9.99999997E-7 : f32
    %38 = vector.broadcast %cst_4 : f32 to vector<8x128xf32>
    %39 = arith.cmpf olt, %21, %38 : vector<8x128xf32>
    %40 = arith.cmpf ogt, %5, %13 : vector<8x128xf32>
    %cst_5 = arith.constant 0.000000e+00 : f32
    %41 = vector.broadcast %cst_5 : f32 to vector<8x128xf32>
    %42 = arith.subf %41, %13 : vector<8x128xf32>
    %43 = arith.cmpf olt, %5, %42 : vector<8x128xf32>
    %44 = arith.andi %39, %40 : vector<8x128xi1>
    %cst_6 = arith.constant dense<true> : vector<8x128xi1>
    %45 = arith.xori %40, %cst_6 : vector<8x128xi1>
    %46 = arith.andi %39, %45 : vector<8x128xi1>
    %cst_7 = arith.constant dense<true> : vector<8x128xi1>
    %47 = arith.xori %39, %cst_7 : vector<8x128xi1>
    %48 = arith.andi %47, %43 : vector<8x128xi1>
    %49 = arith.subf %19, %15 : vector<8x128xf32>
    %50 = arith.subf %9, %17 : vector<8x128xf32>
    %51 = arith.subf %11, %7 : vector<8x128xf32>
    %52 = arith.select %48, %51, %37 : vector<8x128xi1>, vector<8x128xf32>
    %53 = arith.select %46, %50, %52 : vector<8x128xi1>, vector<8x128xf32>
    %54 = arith.select %44, %49, %53 : vector<8x128xi1>, vector<8x128xf32>
    %55 = arith.addf %11, %7 : vector<8x128xf32>
    %56 = arith.addf %9, %17 : vector<8x128xf32>
    %57 = arith.subf %19, %15 : vector<8x128xf32>
    %58 = arith.select %48, %56, %57 : vector<8x128xi1>, vector<8x128xf32>
    %59 = arith.select %46, %55, %58 : vector<8x128xi1>, vector<8x128xf32>
    %60 = arith.select %44, %25, %59 : vector<8x128xi1>, vector<8x128xf32>
    %61 = arith.addf %11, %7 : vector<8x128xf32>
    %62 = arith.addf %19, %15 : vector<8x128xf32>
    %63 = arith.subf %9, %17 : vector<8x128xf32>
    %64 = arith.select %48, %62, %63 : vector<8x128xi1>, vector<8x128xf32>
    %65 = arith.select %46, %29, %64 : vector<8x128xi1>, vector<8x128xf32>
    %66 = arith.select %44, %61, %65 : vector<8x128xi1>, vector<8x128xf32>
    %67 = arith.addf %9, %17 : vector<8x128xf32>
    %68 = arith.addf %19, %15 : vector<8x128xf32>
    %69 = arith.subf %11, %7 : vector<8x128xf32>
    %70 = arith.select %48, %33, %69 : vector<8x128xi1>, vector<8x128xf32>
    %71 = arith.select %46, %68, %70 : vector<8x128xi1>, vector<8x128xf32>
    %72 = arith.select %44, %67, %71 : vector<8x128xi1>, vector<8x128xf32>
    %73 = arith.select %48, %33, %37 : vector<8x128xi1>, vector<8x128xf32>
    %74 = arith.select %46, %29, %73 : vector<8x128xi1>, vector<8x128xf32>
    %75 = arith.select %44, %25, %74 : vector<8x128xi1>, vector<8x128xf32>
    %76 = math.rsqrt %75 : vector<8x128xf32>
    %cst_8 = arith.constant 5.000000e-01 : f32
    %77 = vector.broadcast %cst_8 : f32 to vector<8x128xf32>
    %78 = arith.mulf %77, %75 : vector<8x128xf32>
    %79 = arith.mulf %78, %76 : vector<8x128xf32>
    %80 = arith.mulf %79, %76 : vector<8x128xf32>
    %cst_9 = arith.constant 1.500000e+00 : f32
    %81 = vector.broadcast %cst_9 : f32 to vector<8x128xf32>
    %82 = arith.subf %81, %80 : vector<8x128xf32>
    %83 = arith.mulf %76, %82 : vector<8x128xf32>
    %cst_10 = arith.constant 5.000000e-01 : f32
    %84 = vector.broadcast %cst_10 : f32 to vector<8x128xf32>
    %85 = arith.mulf %84, %83 : vector<8x128xf32>
    %86 = arith.mulf %54, %85 : vector<8x128xf32>
    %87 = arith.mulf %60, %85 : vector<8x128xf32>
    %88 = arith.mulf %66, %85 : vector<8x128xf32>
    %89 = arith.mulf %72, %85 : vector<8x128xf32>
    %90 = arith.mulf %87, %87 : vector<8x128xf32>
    %91 = arith.mulf %88, %88 : vector<8x128xf32>
    %92 = arith.addf %90, %91 : vector<8x128xf32>
    %93 = arith.mulf %89, %89 : vector<8x128xf32>
    %94 = arith.addf %92, %93 : vector<8x128xf32>
    %cst_11 = arith.constant 1.000000e-30 : f32
    %95 = vector.broadcast %cst_11 : f32 to vector<8x128xf32>
    %96 = arith.maximumf %94, %95 : vector<8x128xf32>
    %97 = math.rsqrt %96 : vector<8x128xf32>
    %cst_12 = arith.constant 5.000000e-01 : f32
    %98 = vector.broadcast %cst_12 : f32 to vector<8x128xf32>
    %99 = arith.mulf %98, %96 : vector<8x128xf32>
    %100 = arith.mulf %99, %97 : vector<8x128xf32>
    %101 = arith.mulf %100, %97 : vector<8x128xf32>
    %cst_13 = arith.constant 1.500000e+00 : f32
    %102 = vector.broadcast %cst_13 : f32 to vector<8x128xf32>
    %103 = arith.subf %102, %101 : vector<8x128xf32>
    %104 = arith.mulf %97, %103 : vector<8x128xf32>
    %105 = arith.mulf %94, %104 : vector<8x128xf32>
    %106 = math.absf %86 : vector<8x128xf32>
    %107 = arith.maximumf %106, %105 : vector<8x128xf32>
    %108 = arith.minimumf %106, %105 : vector<8x128xf32>
    %cst_14 = arith.constant 1.000000e-30 : f32
    %109 = vector.broadcast %cst_14 : f32 to vector<8x128xf32>
    %110 = arith.maximumf %107, %109 : vector<8x128xf32>
    %111 = arith.divf %108, %110 : vector<8x128xf32>
    %cst_15 = arith.constant 0.414213568 : f32
    %112 = vector.broadcast %cst_15 : f32 to vector<8x128xf32>
    %113 = arith.cmpf ogt, %111, %112 : vector<8x128xf32>
    %cst_16 = arith.constant 1.000000e+00 : f32
    %114 = vector.broadcast %cst_16 : f32 to vector<8x128xf32>
    %115 = arith.subf %111, %114 : vector<8x128xf32>
    %cst_17 = arith.constant 1.000000e+00 : f32
    %116 = vector.broadcast %cst_17 : f32 to vector<8x128xf32>
    %117 = arith.addf %111, %116 : vector<8x128xf32>
    %118 = arith.divf %115, %117 : vector<8x128xf32>
    %119 = arith.select %113, %118, %111 : vector<8x128xi1>, vector<8x128xf32>
    %120 = arith.mulf %119, %119 : vector<8x128xf32>
    %cst_18 = arith.constant 0.0805374458 : f32
    %121 = vector.broadcast %cst_18 : f32 to vector<8x128xf32>
    %122 = arith.mulf %121, %120 : vector<8x128xf32>
    %cst_19 = arith.constant 0.138776854 : f32
    %123 = vector.broadcast %cst_19 : f32 to vector<8x128xf32>
    %124 = arith.subf %122, %123 : vector<8x128xf32>
    %125 = arith.mulf %124, %120 : vector<8x128xf32>
    %cst_20 = arith.constant 0.199777111 : f32
    %126 = vector.broadcast %cst_20 : f32 to vector<8x128xf32>
    %127 = arith.addf %125, %126 : vector<8x128xf32>
    %128 = arith.mulf %127, %120 : vector<8x128xf32>
    %cst_21 = arith.constant 0.333329499 : f32
    %129 = vector.broadcast %cst_21 : f32 to vector<8x128xf32>
    %130 = arith.subf %128, %129 : vector<8x128xf32>
    %131 = arith.mulf %130, %120 : vector<8x128xf32>
    %132 = arith.mulf %131, %119 : vector<8x128xf32>
    %133 = arith.addf %132, %119 : vector<8x128xf32>
    %cst_22 = arith.constant 0.785398185 : f32
    %134 = vector.broadcast %cst_22 : f32 to vector<8x128xf32>
    %135 = arith.addf %133, %134 : vector<8x128xf32>
    %136 = arith.select %113, %135, %133 : vector<8x128xi1>, vector<8x128xf32>
    %137 = arith.cmpf ogt, %105, %106 : vector<8x128xf32>
    %cst_23 = arith.constant 1.57079637 : f32
    %138 = vector.broadcast %cst_23 : f32 to vector<8x128xf32>
    %139 = arith.subf %138, %136 : vector<8x128xf32>
    %140 = arith.select %137, %139, %136 : vector<8x128xi1>, vector<8x128xf32>
    %cst_24 = arith.constant 0.000000e+00 : f32
    %141 = vector.broadcast %cst_24 : f32 to vector<8x128xf32>
    %142 = arith.cmpf olt, %86, %141 : vector<8x128xf32>
    %cst_25 = arith.constant 0.000000e+00 : f32
    %143 = vector.broadcast %cst_25 : f32 to vector<8x128xf32>
    %144 = arith.subf %143, %140 : vector<8x128xf32>
    %145 = arith.select %142, %144, %140 : vector<8x128xi1>, vector<8x128xf32>
    %cst_26 = arith.constant 2.000000e+00 : f32
    %146 = vector.broadcast %cst_26 : f32 to vector<8x128xf32>
    %147 = arith.mulf %146, %145 : vector<8x128xf32>
    %cst_27 = arith.constant 0.000000e+00 : f32
    %148 = vector.broadcast %cst_27 : f32 to vector<8x128xf32>
    %149 = arith.cmpf ogt, %94, %148 : vector<8x128xf32>
    %150 = arith.mulf %147, %104 : vector<8x128xf32>
    %cst_28 = arith.constant 2.000000e+00 : f32
    %151 = vector.broadcast %cst_28 : f32 to vector<8x128xf32>
    %152 = arith.select %149, %150, %151 : vector<8x128xi1>, vector<8x128xf32>
    %153 = arith.mulf %87, %152 : vector<8x128xf32>
    %154 = arith.mulf %88, %152 : vector<8x128xf32>
    %155 = arith.mulf %89, %152 : vector<8x128xf32>
    %156 = arith.cmpf one, %153, %153 : vector<8x128xf32>
    %cst_29 = arith.constant 0.000000e+00 : f32
    %157 = vector.broadcast %cst_29 : f32 to vector<8x128xf32>
    %158 = arith.select %156, %157, %153 : vector<8x128xi1>, vector<8x128xf32>
    %159 = arith.cmpf one, %154, %154 : vector<8x128xf32>
    %cst_30 = arith.constant 0.000000e+00 : f32
    %160 = vector.broadcast %cst_30 : f32 to vector<8x128xf32>
    %161 = arith.select %159, %160, %154 : vector<8x128xi1>, vector<8x128xf32>
    %162 = arith.cmpf one, %155, %155 : vector<8x128xf32>
    %cst_31 = arith.constant 0.000000e+00 : f32
    %163 = vector.broadcast %cst_31 : f32 to vector<8x128xf32>
    %164 = arith.select %162, %163, %155 : vector<8x128xi1>, vector<8x128xf32>
    %c0_32 = arith.constant 0 : index
    %165 = arith.index_cast %1 : i32 to index
    %c0_33 = arith.constant 0 : index
    %166 = vector.load %arg2[%c0_32, %165, %c0_33] : memref<3x8x128xf32, #tpu.memory_space<vmem>>, vector<1x8x128xf32>
    %167 = vector.shape_cast %166 : vector<1x8x128xf32> to vector<8x128xf32>
    %168 = vector.shape_cast %158 : vector<8x128xf32> to vector<1x8x128xf32>
    tpu.vector_store %arg2[%c0_32, %165, %c0_33], %168 {strides = array<i32>} : memref<3x8x128xf32, #tpu.memory_space<vmem>>, vector<1x8x128xf32>,
    %c1 = arith.constant 1 : index
    %169 = arith.index_cast %1 : i32 to index
    %c0_34 = arith.constant 0 : index
    %170 = vector.load %arg2[%c1, %169, %c0_34] : memref<3x8x128xf32, #tpu.memory_space<vmem>>, vector<1x8x128xf32>
    %171 = vector.shape_cast %170 : vector<1x8x128xf32> to vector<8x128xf32>
    %172 = vector.shape_cast %161 : vector<8x128xf32> to vector<1x8x128xf32>
    tpu.vector_store %arg2[%c1, %169, %c0_34], %172 {strides = array<i32>} : memref<3x8x128xf32, #tpu.memory_space<vmem>>, vector<1x8x128xf32>,
    %c2 = arith.constant 2 : index
    %173 = arith.index_cast %1 : i32 to index
    %c0_35 = arith.constant 0 : index
    %174 = vector.load %arg2[%c2, %173, %c0_35] : memref<3x8x128xf32, #tpu.memory_space<vmem>>, vector<1x8x128xf32>
    %175 = vector.shape_cast %174 : vector<1x8x128xf32> to vector<8x128xf32>
    %176 = vector.shape_cast %164 : vector<8x128xf32> to vector<1x8x128xf32>
    tpu.vector_store %arg2[%c2, %173, %c0_35], %176 {strides = array<i32>} : memref<3x8x128xf32, #tpu.memory_space<vmem>>, vector<1x8x128xf32>,
    %c1_i32 = arith.constant 1 : i32
    return
  }
  func.func @transform_0(%arg0: i32) -> (i32, i32, i32) {
    %c0_i32 = arith.constant 0 : i32
    %c0_i32_0 = arith.constant 0 : i32
    %c0_i32_1 = arith.constant 0 : i32
    return %c0_i32, %arg0, %c0_i32_0 : i32, i32, i32
  }
  func.func @transform_1(%arg0: i32) -> (i32, i32, i32) {
    %c0_i32 = arith.constant 0 : i32
    %c0_i32_0 = arith.constant 0 : i32
    %c0_i32_1 = arith.constant 0 : i32
    return %c0_i32, %arg0, %c0_i32_0 : i32, i32, i32
  }
}

</mosaic_0001>

<bundles_post_ra>
// kernel: smplify3d_forward.1
= control target key start
LH: loop header
LB: loop body
LE: loop exit
PB: predicated region body
PF: predicated region fallthrough
CT: control target
= control target key end

     0   :  { %s494_s6 = smov 0   ;;  %s496_s7 = smov 0   ;;  %s614_s0 = inlined_call_operand.vmem [shape: f32[9,16,128], index: 0, kind: input, shape index: {}]   ;;  %s615_s1 = inlined_call_operand.vmem [shape: f32[3,16,128], index: 1, kind: output, shape index: {}]  }
   0x1   :  { %s498_s8 = smov 0  }
   0x2 LB: > { %s409_s9 = sadd.s32 4294967295, %s481_s8   ;;  %s511_s10 = sadd.s32 1, %s481_s8   ;;  %s481_s8 = sphi %s498_s8, %s625_s8   ;;  %s477_s7 = sphi %s496_s7, %s624_s7   ;;  %s473_s6 = sphi %s494_s6, %s623_s6  }
   0x3   : > { %s15_s11 = ssub.s32 %s481_s8, %s511_s10  ;;  %s18_s12 = sadd.s32 1, %s477_s7 }
   0x4   : > { %p16_p0 = scmp.eq.s32.totalorder %s15_s11, 0  ;;  %p25_p1 = scmp.ne.s32.totalorder %s477_s7, %s473_s6 }
   0x5   : > { %p26_p2 = scmp.eq.s32.totalorder %s481_s8, 0  ;;  %p55_p3 = scmp.eq.s32.totalorder %s409_s9, 1 }
   0x6   : > { %s522_s13 = scalar_select %p16_p0, %s477_s7, %s18_s12  }
   0x7   : > { %p27_p4 = por %p26_p2, %p25_p1  ;;  %p524_p5 = por %p55_p3, %p25_p1 }
   0x8   : > { %p412_p6 = scmp.ge.s32.totalorder %s481_s8, 2 }
   0xa   : > { %77 = sbr.rel (%p412_p6) target bundleno = 24 (0x18), region = 16 }
   0xf   : > { %80 = sbr.rel (!%p27_p4) target bundleno = 24 (0x18), region = 20  ;;  %s82_s15 = sand.u32 (%p27_p4), 1, %s477_s7  }
  0x10   : > { %s413_s16 = sshll.u32 (%p27_p4), %s481_s8, 3  ;;  %s423_s17 = smul.u32 (%p27_p4), 72, %s82_s15 }
  0x11   : > { %s86_s20 = scalar_lea.vmem (%p27_p4), %s614_s0, %s413_s16 }
  0x12   : > { %v131_v0 = vld [vmem:[%s86_s20] sm:$0xff] (%p27_p4)  ;;  %v133_v1 = vld [vmem:[%s86_s20 + $0x10] sm:$0xff] (%p27_p4)  ;;  %s84_s21 = scalar_lea.vmem (%p27_p4), [#allocation2], %s423_s17 }
  0x13   : > { %v135_v2 = vld [vmem:[%s86_s20 + $0x20] sm:$0xff] (%p27_p4)  ;;  %v137_v3 = vld [vmem:[%s86_s20 + $0x30] sm:$0xff] (%p27_p4)  ;;  %132 = vst [vmem:[%s84_s21] sm:$0xff] (%p27_p4), %v131_v0  ;;  %134 = vst [vmem:[%s84_s21 + $0x8] sm:$0xff] (%p27_p4), %v133_v1 }
  0x14   : > { %v139_v4 = vld [vmem:[%s86_s20 + $0x40] sm:$0xff]  ;;  %v141_v5 = vld [vmem:[%s86_s20 + $0x50] sm:$0xff]  ;;  %136 = vst [vmem:[%s84_s21 + $0x10] sm:$0xff] %v135_v2  ;;  %138 = vst [vmem:[%s84_s21 + $0x18] sm:$0xff] %v137_v3 }
  0x15   : > { %140 = vst [vmem:[%s84_s21 + $0x20] sm:$0xff] %v139_v4  ;;  %142 = vst [vmem:[%s84_s21 + $0x28] sm:$0xff] %v141_v5  ;;  %v143_v6 = vld [vmem:[%s86_s20 + $0x60] sm:$0xff]  ;;  %v145_v7 = vld [vmem:[%s86_s20 + $0x70] sm:$0xff] }
  0x16   : > { %v147_v8 = vld [vmem:[%s86_s20 + $0x80] sm:$0xff]  ;;  %144 = vst [vmem:[%s84_s21 + $0x30] sm:$0xff] %v143_v6  ;;  %146 = vst [vmem:[%s84_s21 + $0x38] sm:$0xff] %v145_v7 }
  0x17   : > { %148 = vst [vmem:[%s84_s21 + $0x40] sm:$0xff] %v147_v8 }
  0x18 PF: > { %p414_p7 = scmp.ge.s32.totalorder %s481_s8, 1  ;;  %p153_p8 = scmp.lt.s32.totalorder %s481_s8, 3 }
  0x1a   : > { %p154_p9 = pnand %p414_p7, %p153_p8 }
  0x1b   : > { %s160_s22 = sand.u32 (!%p154_p9), 1, %s473_s6  }
  0x1c   : > { %157 = sbr.rel (%p154_p9) target bundleno = 188 (0xbc), region = 58 }
  0x1d   : > { %s424_s23 = smul.u32 (!%p154_p9), 72, %s160_s22 }
  0x1e   : > { %s425_s25 = smul.u32 (!%p154_p9), 24, %s160_s22 }
  0x1f   : > { %s539_s24 = scalar_lea.vmem (!%p154_p9), [#allocation2], %s424_s23 }
  0x20   : > { %s177_s26 = scalar_lea.vmem (!%p154_p9), [#allocation3], %s425_s25 }
  0x21   : > { %v178_v9 = vld [vmem:[%s539_s24] sm:$0xff]  ;;  %vm483_vm3 = vmmov 1   ;;  %v179_v29 = vld [vmem:[%s539_s24 + $0x8] sm:$0xff]  ;;  %v180_v30 = vld [vmem:[%s539_s24 + $0x10] sm:$0xff]  ;;  %s420_s27 = sshll.u32 (%p524_p5), %s409_s9, 3 }
  0x22   : > { %v182_v10 = vld [vmem:[%s539_s24 + $0x20] sm:$0xff]  ;;  %v187_v11 = vadd.f32 1.0, %v178_v9  ;;  %v190_v12 = vsub.f32 1.0, %v178_v9  ;;  %v181_v31 = vld [vmem:[%s539_s24 + $0x18] sm:$0xff]  ;;  %v183_v32 = vld [vmem:[%s539_s24 + $0x28] sm:$0xff]  ;;  %s309_s30 = scalar_lea.vmem (%p524_p5), %s615_s1, %s420_s27 }
  0x23   : > { %v186_v13 = vld [vmem:[%s539_s24 + $0x40] sm:$0xff]  ;;  %v199_v14 = vsub.f32 0.0, %v182_v10  ;;  %vm198_vm0 = vcmp.gt.f32.partialorder %v178_v9, %v182_v10  ;;  %v184_v33 = vld [vmem:[%s539_s24 + $0x30] sm:$0xff]  ;;  %v185_v34 = vld [vmem:[%s539_s24 + $0x38] sm:$0xff]  ;;  %v208_v35 = vsub.f32 %v181_v31, %v179_v29  ;;  %v212_v42 = vadd.f32 %v181_v31, %v179_v29 }
  0x24   : > { %v193_v15 = vsub.f32 %v190_v12, %v182_v10  ;;  %v195_v16 = vadd.f32 %v187_v11, %v182_v10  ;;  %vm197_vm1 = vcmp.lt.f32.partialorder %v186_v13, 1e-06  ;;  %v191_v17 = vadd.f32 %v190_v12, %v182_v10  ;;  %vm202_vm4 = vmxor %vm198_vm0, %vm483_vm3 }
  0x25   : > { %v188_v18 = vsub.f32 %v187_v11, %v182_v10  ;;  %vm200_vm2 = vcmp.lt.f32.partialorder %v178_v9, %v199_v14  ;;  %vm204_vm5 = vmxor %vm197_vm1, %vm483_vm3  ;;  %v206_v37 = vsub.f32 %v185_v34, %v183_v32  ;;  %v207_v38 = vsub.f32 %v180_v30, %v184_v33 }
  0x26   : > { %v194_v19 = vadd.f32 %v193_v15, %v186_v13  ;;  %v196_v20 = vadd.f32 %v195_v16, %v186_v13  ;;  %v192_v21 = vsub.f32 %v191_v17, %v186_v13  ;;  %vm545_vm6 = vmand %vm204_vm5, %vm200_vm2  ;;  %v213_v39 = vadd.f32 %v184_v33, %v180_v30 }
  0x27   : > { %v189_v23 = vsub.f32 %v188_v18, %v186_v13  ;;  %vm549_vm7 = vmand %vm197_vm1, %vm202_vm4  ;;  %v217_v40 = vadd.f32 %v185_v34, %v183_v32 }
  0x28   : > { %vm554_vm8 = vmand %vm197_vm1, %vm198_vm0  ;;  %v224_v26 = vsel %vm545_vm6, %v194_v19, %v196_v20  ;;  %v214_v44 = vsel %vm545_vm6, %v213_v39, %v206_v37  ;;  %v221_v46 = vsel %vm545_vm6, %v194_v19, %v208_v35  ;;  %v209_v2 = vsel %vm545_vm6, %v208_v35, %v196_v20 }
  0x29   : > { %v225_v27 = vsel %vm549_vm7, %v192_v21, %v224_v26  ;;  %v218_v45 = vsel %vm545_vm6, %v217_v40, %v207_v38  ;;  %v215_v48 = vsel %vm549_vm7, %v212_v42, %v214_v44  ;;  %v222_v50 = vsel %vm549_vm7, %v217_v40, %v221_v46 }
  0x2a   : > { %v226_v28 = vsel %vm554_vm8, %v189_v23, %v225_v27  ;;  %v219_v49 = vsel %vm549_vm7, %v192_v21, %v218_v45  ;;  %v216_v53 = vsel %vm554_vm8, %v189_v23, %v215_v48  ;;  %v223_v55 = vsel %vm554_vm8, %v213_v39, %v222_v50 }
  0x2b   : > { %451 = vrsqrt.f32 %v226_v28  ;;  %v228_v36 = vmul.f32 0.5, %v226_v28  ;;  %v220_v54 = vsel %vm554_vm8, %v212_v42, %v219_v49  ;;  %v210_v3 = vsel %vm549_vm7, %v207_v38, %v209_v2 }
  0x2c   : > { %v211_v6 = vsel %vm554_vm8, %v206_v37, %v210_v3 }
  0x38   : > { %v452_v41 = vpop.eup %451 }
  0x39   : > { %v229_v43 = vmul.f32 %v452_v41, %v228_v36 }
  0x3b   : > { %v230_v47 = vmul.f32 %v452_v41, %v229_v43 }
  0x3d   : > { %v231_v51 = vsub.f32 1.5, %v230_v47 }
  0x3f   : > { %v232_v52 = vmul.f32 %v452_v41, %v231_v51 }
  0x41   : > { %v233_v56 = vmul.f32 0.5, %v232_v52 }
  0x43   : > { %v235_v57 = vmul.f32 %v233_v56, %v216_v53  ;;  %v236_v58 = vmul.f32 %v233_v56, %v220_v54  ;;  %v237_v59 = vmul.f32 %v233_v56, %v223_v55  ;;  %v234_v8 = vmul.f32 %v233_v56, %v211_v6 }
  0x45   : > { %v238_v60 = vmul.f32 %v235_v57, %v235_v57  ;;  %v239_v61 = vmul.f32 %v236_v58, %v236_v58  ;;  %v241_v62 = vmul.f32 %v237_v59, %v237_v59  ;;  %v251_v12 = vand.u32 2147483647, %v234_v8 }
  0x46   : > { %vm278_vm11 = vcmp.lt.f32.partialorder %v234_v8, 0.0 }
  0x47   : > { %v240_v63 = vadd.f32 %v239_v61, %v238_v60 }
  0x49   : > { %v242_v0 = vadd.f32 %v241_v62, %v240_v63 }
  0x4b   : > { %v243_v1 = vmax.f32 %v242_v0, 1e-30  ;;  %vm282_vm12 = vcmp.gt.f32.partialorder %v242_v0, 0.0 }
  0x4d   : > { %453 = vrsqrt.f32 %v243_v1  ;;  %v245_v4 = vmul.f32 0.5, %v243_v1 }
  0x5a   : > { %v454_v5 = vpop.eup %453 }
  0x5b   : > { %v246_v7 = vmul.f32 %v454_v5, %v245_v4 }
  0x5d   : > { %v247_v9 = vmul.f32 %v454_v5, %v246_v7 }
  0x5f   : > { %v248_v10 = vsub.f32 1.5, %v247_v9 }
  0x61   : > { %v249_v11 = vmul.f32 %v454_v5, %v248_v10 }
  0x63   : > { %v250_v13 = vmul.f32 %v249_v11, %v242_v0 }
  0x65   : > { %v252_v14 = vmax.f32 %v251_v12, %v250_v13  ;;  %vm275_vm9 = vcmp.gt.f32.partialorder %v250_v13, %v251_v12  ;;  %v253_v16 = vmin.f32 %v251_v12, %v250_v13 }
  0x67   : > { %v254_v15 = vmax.f32 %v252_v14, 1e-30 }
  0x69   : > { %455 = vrcp.f32 %v254_v15 }
  0x76   : > { %v456_v17 = vpop.eup %455 }
  0x77   : > { %v256_v18 = vmul.f32 %v456_v17, %v253_v16 }
  0x79   : > { %v259_v19 = vadd.f32 1.0, %v256_v18  ;;  %v415_v20 = vadd.f32 -1.0, %v256_v18  ;;  %vm257_vm10 = vcmp.gt.f32.partialorder %v256_v18, 0.41421357 }
  0x7b   : > { %457 = vrcp.f32 %v259_v19 }
  0x88   : > { %v458_v21 = vpop.eup %457 }
  0x89   : > { %v261_v22 = vmul.f32 %v458_v21, %v415_v20 }
  0x8b   : > { %v262_v23 = vsel %vm257_vm10, %v261_v22, %v256_v18 }
  0x8c   : > { %v263_v24 = vmul.f32 %v262_v23, %v262_v23 }
  0x8e   : > { %v264_v25 = vmul.f32 0.080537446, %v263_v24 }
  0x90   : > { %v416_v26 = vadd.f32 -0.13877685, %v264_v25 }
  0x92   : > { %v266_v27 = vmul.f32 %v416_v26, %v263_v24 }
  0x94   : > { %v267_v28 = vadd.f32 0.19977711, %v266_v27 }
  0x96   : > { %v268_v29 = vmul.f32 %v267_v28, %v263_v24 }
  0x98   : > { %v417_v30 = vadd.f32 -0.3333295, %v268_v29 }
  0x9a   : > { %v270_v31 = vmul.f32 %v417_v30, %v263_v24 }
  0x9c   : > { %v271_v32 = vmul.f32 %v270_v31, %v262_v23 }
  0x9e   : > { %v272_v33 = vadd.f32 %v271_v32, %v262_v23 }
  0xa0   : > { %v273_v34 = vadd.f32 0.7853982, %v272_v33 }
  0xa2   : > { %v274_v35 = vsel %vm257_vm10, %v273_v34, %v272_v33 }
  0xa3   : > { %v276_v36 = vsub.f32 1.5707964, %v274_v35 }
  0xa5   : > { %v277_v37 = vsel %vm275_vm9, %v276_v36, %v274_v35 }
  0xa6   : > { %v279_v38 = vsub.f32 0.0, %v277_v37 }
  0xa8   : > { %v280_v39 = vsel %vm278_vm11, %v279_v38, %v277_v37 }
  0xa9   : > { %v281_v40 = vmul.f32 2.0, %v280_v39 }
  0xab   : > { %v283_v41 = vmul.f32 %v281_v40, %v249_v11 }
  0xad   : > { %v284_v42 = vsel %vm282_vm12, %v283_v41, 2.0 }
  0xae   : > { %v285_v43 = vmul.f32 %v284_v42, %v235_v57  ;;  %v286_v44 = vmul.f32 %v284_v42, %v236_v58  ;;  %v287_v45 = vmul.f32 %v284_v42, %v237_v59 }
  0xaf   : > { %307 = sbr.rel (!%p524_p5) target bundleno = 188 (0xbc), region = 66 }
  0xb0   : > { %vm288_vm13 = vcmp.ne.f32.partialorder %v285_v43, %v285_v43  ;;  %vm290_vm14 = vcmp.ne.f32.partialorder %v286_v44, %v286_v44  ;;  %vm292_vm15 = vcmp.ne.f32.partialorder %v287_v45, %v287_v45 }
  0xb1   : > { %v289_v46 = vsel %vm288_vm13, 0.0, %v285_v43  ;;  %v291_v47 = vsel %vm290_vm14, 0.0, %v286_v44  ;;  %v293_v48 = vsel %vm292_vm15, 0.0, %v287_v45 }
  0xb2   : > { %294 = vst [vmem:[%s177_s26] sm:$0xff] %v289_v46  ;;  %418 = vst [vmem:[%s177_s26 + $0x8] sm:$0xff] %v291_v47 }
  0xb3   : > { %419 = vst [vmem:[%s177_s26 + $0x10] sm:$0xff] %v293_v48 }
  0xb9   : > { %v342_v49 = vld [vmem:[%s177_s26] sm:$0xff]  ;;  %v344_v50 = vld [vmem:[%s177_s26 + $0x8] sm:$0xff] }
  0xba   : > { %v346_v51 = vld [vmem:[%s177_s26 + $0x10] sm:$0xff]  ;;  %343 = vst [vmem:[%s309_s30] sm:$0xff] %v342_v49  ;;  %345 = vst [vmem:[%s309_s30 + $0x10] sm:$0xff] %v344_v50 }
  0xbb   : > { %347 = vst [vmem:[%s309_s30 + $0x20] sm:$0xff] %v346_v51 }
  0xbc PF: > { %p8_p10 = scmp.ge.s32.totalorder %s511_s10, 4   ;;  %s623_s6 = smov %s477_s7 }
  0xbd   : > { %s624_s7 = smov %s522_s13  ;;  %s625_s8 = smov %s511_s10 }
  0xbe   :  { %10 = sbr.rel (!%p8_p10) target bundleno = 2 (0x2), region = 137 }

</bundles_post_ra>
